<compile_context>
chip_gen: v5e
topology: v5e:2x2
jax: 0.10.0
libtpu: 0.0.40
codegen_flags: <defaults>
</compile_context>

<pallas_src>
import jax
import jax.numpy as jnp
from jax.experimental import pallas as pl
from jax.experimental.pallas import tpu as pltpu

HIDDEN = 64


def _round_up(x, m):
    return (x + m - 1) // m * m


def income_net_kernel(x_ref, w1_ref, b1_ref, w2_ref, b2_ref, o_ref):
    # x_ref : [D_pad, TB]  bf16   (batch tile on the 128-lane axis)
    # w1_ref: [64, D_pad]  bf16   (PyTorch [out, in] orientation)
    # b1_ref: [64, 1]      f32
    # w2_ref: [C, 64]      bf16
    # b2_ref: [C, 1]       f32
    # o_ref : [C, TB]      f32    (lane-dense store)
    h = jnp.dot(w1_ref[...], x_ref[...], preferred_element_type=jnp.float32)
    h = jnp.maximum(h + b1_ref[...], 0.0)                 # bias + ReLU in f32 (VPU)
    y = jnp.dot(w2_ref[...], h.astype(w2_ref.dtype),
                preferred_element_type=jnp.float32)
    o_ref[...] = (y + b2_ref[...]).astype(o_ref.dtype)


def income_net_forward(x, w1, b1, w2, b2, *, max_batch_tile=1024):
    """Fused IncomeNet forward: relu(x @ w1 + b1) @ w2 + b2.

    x : [B, input_size]
    w1: [input_size, 64]  (transposed vs. PyTorch's [out, in]),  b1: [64]
    w2: [64, num_classes],                                       b2: [num_classes]
    Returns logits [B, num_classes] in float32.
    """
    B, D = x.shape
    H, C = w2.shape
    assert w1.shape == (D, H) and H == HIDDEN

    # Batch tile on the lane axis: multiple of 128, capped at max_batch_tile.
    TB = min(max_batch_tile, _round_up(max(B, 1), 128))
    B_pad = _round_up(max(B, 1), TB)
    D_pad = _round_up(D, 16)            # bf16 sublane packing

    # Transposed, zero-padded bf16 input stream (dominant HBM traffic).
    xT = jnp.zeros((D_pad, B_pad), jnp.bfloat16)
    xT = xT.at[:D, :B].set(x.T.astype(jnp.bfloat16))

    # Weights in [out, in] orientation; biases as f32 columns.
    w1_t = jnp.zeros((H, D_pad), jnp.bfloat16).at[:, :D].set(w1.T.astype(jnp.bfloat16))
    w2_t = w2.T.astype(jnp.bfloat16)                        # [C, 64]
    b1_c = jnp.reshape(b1, (H, 1)).astype(jnp.float32)
    b2_c = jnp.reshape(b2, (C, 1)).astype(jnp.float32)

    grid = (B_pad // TB,)
    flops = 2 * B_pad * (D_pad * H + H * C)
    bytes_accessed = (xT.size * 2 + w1_t.size * 2 + w2_t.size * 2
                      + b1_c.size * 4 + b2_c.size * 4 + C * B_pad * 4)

    yT = pl.pallas_call(
        income_net_kernel,
        out_shape=jax.ShapeDtypeStruct((C, B_pad), jnp.float32),
        grid_spec=pltpu.PrefetchScalarGridSpec(
            num_scalar_prefetch=0,
            grid=grid,
            in_specs=[
                pl.BlockSpec((D_pad, TB), lambda i: (0, i)),   # x tile: streamed/pipelined
                pl.BlockSpec((H, D_pad), lambda i: (0, 0)),    # w1: VMEM-resident
                pl.BlockSpec((H, 1), lambda i: (0, 0)),        # b1: VMEM-resident
                pl.BlockSpec((C, H), lambda i: (0, 0)),        # w2: VMEM-resident
                pl.BlockSpec((C, 1), lambda i: (0, 0)),        # b2: VMEM-resident
            ],
            out_specs=pl.BlockSpec((C, TB), lambda i: (0, i)),
        ),
        compiler_params=pltpu.CompilerParams(
            dimension_semantics=("parallel",),        # shard batch tiles across TCs (v7x)
            vmem_limit_bytes=48 * 1024 * 1024,        # headroom vs v7x's 64 MiB VMEM
        ),
        cost_estimate=pl.CostEstimate(
            flops=flops, transcendentals=0, bytes_accessed=bytes_accessed),
    )(xT, w1_t, b1_c, w2_t, b2_c)

    # Back to [B, num_classes]; drop batch padding.
    return yT[:, :B].T


def init_params(key, input_size, num_classes, hidden=HIDDEN):
    """Deterministic init mirroring nn.Linear's U(-1/sqrt(fan_in), 1/sqrt(fan_in))."""
    k1, k2, k3, k4 = jax.random.split(key, 4)
    bound1 = 1.0 / jnp.sqrt(jnp.float32(input_size))
    bound2 = 1.0 / jnp.sqrt(jnp.float32(hidden))
    # Stored transposed relative to PyTorch's [out, in] convention.
    w1 = jax.random.uniform(k1, (input_size, hidden), jnp.float32, -bound1, bound1)
    b1 = jax.random.uniform(k2, (hidden,), jnp.float32, -bound1, bound1)
    w2 = jax.random.uniform(k3, (hidden, num_classes), jnp.float32, -bound2, bound2)
    b2 = jax.random.uniform(k4, (num_classes,), jnp.float32, -bound2, bound2)
    return w1, b1, w2, b2


if __name__ == "__main__":
    input_size = 32   # number of tabular income features
    num_classes = 2   # binary income bracket classification
    batch = 8

    key = jax.random.PRNGKey(0)
    kx, kp = jax.random.split(key)
    x = jax.random.normal(kx, (batch, input_size), dtype=jnp.float32)
    w1, b1, w2, b2 = init_params(kp, input_size, num_classes)

    out = income_net_forward(x, w1, b1, w2, b2)
    out = jax.block_until_ready(out)

    # Pure-JAX f32 reference (same math as the PyTorch forward).
    ref = jnp.maximum(x @ w1 + b1[None, :], 0.0) @ w2 + b2[None, :]
    assert out.shape == (batch, num_classes)
    # bf16 inputs/weights -> looser tolerance vs the f32 reference.
    assert jnp.allclose(out, ref, atol=2e-2, rtol=2e-2), (
        f"max abs err = {jnp.max(jnp.abs(out - ref))}")

    print("KERNEL_OK")
</pallas_src>

<mosaic_0001>
module attributes {stable_mosaic.version = 11 : i64} {
  func.func @income_net_kernel(%arg0: i32, %arg1: memref<32x128xbf16, #tpu.memory_space<vmem>>, %arg2: memref<64x32xbf16, #tpu.memory_space<vmem>>, %arg3: memref<64x1xf32, #tpu.memory_space<vmem>>, %arg4: memref<2x64xbf16, #tpu.memory_space<vmem>>, %arg5: memref<2x1xf32, #tpu.memory_space<vmem>>, %arg6: memref<2x128xf32, #tpu.memory_space<vmem>>) attributes {dimension_semantics = [#tpu.dimension_semantics<parallel>], iteration_bounds = array<i64: 1>, scalar_prefetch = 0 : i64, scratch_operands = 0 : i64, tpu.core_type = #tpu.core_type<tc>, window_params = [{transform_indices = @transform_0, window_bounds = array<i64: 32, 128>}, {pipeline_mode = #tpu.pipeline_mode<synchronous>, transform_indices = @transform_1, window_bounds = array<i64: 64, 32>}, {pipeline_mode = #tpu.pipeline_mode<synchronous>, transform_indices = @transform_2, window_bounds = array<i64: 64, 1>}, {pipeline_mode = #tpu.pipeline_mode<synchronous>, transform_indices = @transform_3, window_bounds = array<i64: 2, 64>}, {pipeline_mode = #tpu.pipeline_mode<synchronous>, transform_indices = @transform_4, window_bounds = array<i64: 2, 1>}, {transform_indices = @transform_5, window_bounds = array<i64: 2, 128>}]} {
    %c0 = arith.constant 0 : index
    %c0_0 = arith.constant 0 : index
    %0 = vector.load %arg2[%c0, %c0_0] : memref<64x32xbf16, #tpu.memory_space<vmem>>, vector<64x32xbf16>
    %c0_1 = arith.constant 0 : index
    %c0_2 = arith.constant 0 : index
    %1 = vector.load %arg1[%c0_1, %c0_2] : memref<32x128xbf16, #tpu.memory_space<vmem>>, vector<32x128xbf16>
    %cst = arith.constant dense<0.000000e+00> : vector<64x128xf32>
    %2 = tpu.matmul %0, %1, %cst {dimension_numbers = #tpu.dot_dimension_numbers<[1], [0], [0], [1], [0, 0, 1, 1], [], []>} : vector<64x32xbf16>, vector<32x128xbf16>, vector<64x128xf32> -> vector<64x128xf32>
    %c0_3 = arith.constant 0 : index
    %c0_4 = arith.constant 0 : index
    %3 = vector.load %arg3[%c0_3, %c0_4] : memref<64x1xf32, #tpu.memory_space<vmem>>, vector<64x1xf32>
    %4 = vector.broadcast %3 : vector<64x1xf32> to vector<64x128xf32>
    %5 = arith.addf %2, %4 : vector<64x128xf32>
    %cst_5 = arith.constant 0.000000e+00 : f32
    %6 = vector.broadcast %cst_5 : f32 to vector<64x128xf32>
    %7 = arith.maximumf %5, %6 : vector<64x128xf32>
    %c0_6 = arith.constant 0 : index
    %c0_7 = arith.constant 0 : index
    %8 = vector.load %arg4[%c0_6, %c0_7] : memref<2x64xbf16, #tpu.memory_space<vmem>>, vector<2x64xbf16>
    %9 = arith.truncf %7 : vector<64x128xf32> to vector<64x128xbf16>
    %cst_8 = arith.constant dense<0.000000e+00> : vector<2x128xf32>
    %10 = tpu.matmul %8, %9, %cst_8 {dimension_numbers = #tpu.dot_dimension_numbers<[1], [0], [0], [1], [0, 0, 1, 1], [], []>} : vector<2x64xbf16>, vector<64x128xbf16>, vector<2x128xf32> -> vector<2x128xf32>
    %c0_9 = arith.constant 0 : index
    %c0_10 = arith.constant 0 : index
    %11 = vector.load %arg5[%c0_9, %c0_10] : memref<2x1xf32, #tpu.memory_space<vmem>>, vector<2x1xf32>
    %12 = vector.broadcast %11 : vector<2x1xf32> to vector<2x128xf32>
    %13 = arith.addf %10, %12 : vector<2x128xf32>
    %c0_11 = arith.constant 0 : index
    %c0_12 = arith.constant 0 : index
    %14 = vector.load %arg6[%c0_11, %c0_12] : memref<2x128xf32, #tpu.memory_space<vmem>>, vector<2x128xf32>
    tpu.vector_store %arg6[%c0_11, %c0_12], %13 {strides = array<i32>} : memref<2x128xf32, #tpu.memory_space<vmem>>, vector<2x128xf32>,
    return
  }
  func.func @transform_0(%arg0: i32) -> (i32, i32) {
    %c0_i32 = arith.constant 0 : i32
    %c0_i32_0 = arith.constant 0 : i32
    return %c0_i32, %arg0 : i32, i32
  }
  func.func @transform_1(%arg0: i32) -> (i32, i32) {
    %c0_i32 = arith.constant 0 : i32
    %c0_i32_0 = arith.constant 0 : i32
    %c0_i32_1 = arith.constant 0 : i32
    return %c0_i32, %c0_i32_0 : i32, i32
  }
  func.func @transform_2(%arg0: i32) -> (i32, i32) {
    %c0_i32 = arith.constant 0 : i32
    %c0_i32_0 = arith.constant 0 : i32
    %c0_i32_1 = arith.constant 0 : i32
    return %c0_i32, %c0_i32_0 : i32, i32
  }
  func.func @transform_3(%arg0: i32) -> (i32, i32) {
    %c0_i32 = arith.constant 0 : i32
    %c0_i32_0 = arith.constant 0 : i32
    %c0_i32_1 = arith.constant 0 : i32
    return %c0_i32, %c0_i32_0 : i32, i32
  }
  func.func @transform_4(%arg0: i32) -> (i32, i32) {
    %c0_i32 = arith.constant 0 : i32
    %c0_i32_0 = arith.constant 0 : i32
    %c0_i32_1 = arith.constant 0 : i32
    return %c0_i32, %c0_i32_0 : i32, i32
  }
  func.func @transform_5(%arg0: i32) -> (i32, i32) {
    %c0_i32 = arith.constant 0 : i32
    %c0_i32_0 = arith.constant 0 : i32
    return %c0_i32, %arg0 : i32, i32
  }
}

</mosaic_0001>

<bundles_post_ra>
// kernel: tpu_custom_call.1
= control target key start
LH: loop header
LB: loop body
LE: loop exit
PB: predicated region body
PF: predicated region fallthrough
CT: control target
= control target key end

     0   :  { %v279_v1 = vmov 0   ;;  %s366_s0 = inlined_call_operand.vmem [shape: bf16[32,128], index: 0, kind: input, shape index: {}]   ;;  %s367_s1 = inlined_call_operand.vmem [shape: bf16[64,32], index: 1, kind: input, shape index: {}]   ;;  %s368_s2 = inlined_call_operand.vmem [shape: f32[64,1], index: 2, kind: input, shape index: {}]   ;;  %s369_s3 = inlined_call_operand.vmem [shape: bf16[2,64], index: 3, kind: input, shape index: {}]   ;;  %s370_s4 = inlined_call_operand.vmem [shape: f32[2,1], index: 4, kind: input, shape index: {}]   ;;  %s371_s5 = inlined_call_operand.hbm [shape: f32[2,128], index: 5, kind: output, shape index: {}]  }
   0x1   :  { %v243_v0 = vld [vmem:[%s366_s0 + $0x8] sm:$0xff]  ;;  %251 = vset.pattern.permute.xlu1 %v279_v1  ;;  %250 = vset.pattern.permute.xlu0 %v279_v1  ;;  %v40_v2 = vld [vmem:[%s368_s2 + $0x30] sm:$0xff]  ;;  %v242_v3 = vld [vmem:[%s366_s0] sm:$0xff] }
   0x2   :  { %244 = vmatpush.bf16.msra.mxu2 %v243_v0  ;;  %245 = vmatpush.bf16.msra.mxu3 %v243_v0  ;;  %v38_v4 = vld [vmem:[%s368_s2 + $0x20] sm:$0xff]  ;;  %v36_v5 = vld [vmem:[%s368_s2 + $0x10] sm:$0xff]  ;;  %v239_v6 = vld [vmem:[%s367_s1 + $0x8] sm:$0xff] }
   0x3   :  { %133 = vmatpush.bf16.msra.mxu0 %v243_v0  ;;  %74 = vperm.xlu0 %250, %v40_v2   ;;  %v241_v7 = vld [vmem:[%s367_s1 + $0x18] sm:$0xff] }
   0x4   :  { %64 = vperm.xlu1 %251, %v38_v4   ;;  %252 = vset.pattern.permute.xlu2 %v279_v1 }
   0x5   :  { %54 = vperm.xlu2 %252, %v36_v5  }
   0x6   :  { %10 = vsyncpa [#allocation3], 0  ;;  %246 = vmatpush.bf16.msra.mxu2 %v242_v3  ;;  %vm114_vm0 = vcmask 261120   ;;  %247 = vmatpush.bf16.msra.mxu3 %v242_v3  ;;  %v238_v8 = vld [vmem:[%s367_s1] sm:$0xff]  ;;  %v41_v9 = vld [vmem:[%s368_s2 + $0x38] sm:$0xff]  ;;  %vm175_vm1 = vcmask 523264  }
   0x7   :  { %134 = vmatpush.bf16.msra.mxu0 %v242_v3  ;;  %v39_v10 = vld [vmem:[%s368_s2 + $0x28] sm:$0xff]  ;;  %v37_v11 = vld [vmem:[%s368_s2 + $0x18] sm:$0xff]  ;;  %v34_v12 = vld [vmem:[%s368_s2] sm:$0xff]  ;;  %s200_s25 = sshll.u32 %s371_s5, 4  ;;  %s201_s25 = int_to_ptr.hbm [resolvable:$true] %s200_s25 }
   0x8   :  { %v35_v13 = vld [vmem:[%s368_s2 + $0x8] sm:$0xff]  ;;  %v169_v14 = vld [vmem:[%s370_s4] sm:$0x3]  ;;  %v240_v15 = vld [vmem:[%s367_s1 + $0x10] sm:$0xff]  ;;  %s280_s4 = smov [#allocation2]  }
   0x9   :  { %234 = vmatmul.msk.bf16.vlgmr.msra.gmra.mxu2 %vm114_vm0, %v239_v6  ;;  %236 = vmatmul.msk.bf16.vlgmr.msra.gmra.mxu3 %vm114_vm0, %v241_v7  ;;  %v164_v52 = vld [vmem:[%s369_s3] sm:$0x1]  ;;  %s198_s22 = sshll.u32 %s280_s4, 4  ;;  %s199_s22 = int_to_ptr.vmem [resolvable:$true] %s198_s22 }
   0xa   :  { %233 = vmatmul.msk.bf16.vlgmr.msra.gmra.mxu0 %vm114_vm0, %v238_v8 }
   0xb   :  { %79 = vperm.xlu0 %250, %v41_v9  }
   0xc   :  { %69 = vperm.xlu1 %251, %v39_v10  }
   0xd   :  { %59 = vperm.xlu2 %252, %v37_v11  }
  0x13   :  { %44 = vperm.xlu0 %250, %v34_v12  }
  0x14   :  { %49 = vperm.xlu1 %251, %v35_v13  }
  0x15   :  { %172 = vperm.xlu2 %252, %v169_v14  }
  0x19   :  { %235 = vmatmul.msk.bf16.gmra.mxu2 %vm114_vm0, %v240_v15 }
  0x5f   :  { %v55_v27 = vpop.permute.xlu2 %54 }
  0x67   :  { %v60_v32 = vpop.permute.xlu2 %59 }
  0x6f   :  { %v173_v53 = vpop.permute.xlu2 %172 }
  0x75   :  { %v75_v16 = vpop.permute.xlu0 %74 }
  0x76   :  { %v65_v19 = vpop.permute.xlu1 %64 }
  0x7d   :  { %v80_v21 = vpop.permute.xlu0 %79 }
  0x7e   :  { %v70_v29 = vpop.permute.xlu1 %69 }
  0x85   :  { %v45_v36 = vpop.permute.xlu0 %44 }
  0x86   :  { %v50_v38 = vpop.permute.xlu1 %49 }
  0x87   :  { %v136_v30 = vpop.f32.mrf.mxu0 }
  0x88   :  { %v137_v44 = vadd.f32 %v136_v30, %v45_v36 }
  0x8a   :  { %v156_v48 = vmax.f32 %v137_v44, 0.0 }
  0x8c   :  { %v141_v17 = vpop.f32.mrf.mxu2  ;;  %v151_v18 = vpop.f32.mrf.mxu3 }
  0x8d   :  { %v152_v20 = vadd.f32 %v151_v18, %v75_v16  ;;  %v142_v40 = vadd.f32 %v141_v17, %v55_v27 }
  0x8f   :  { %v162_v24 = vmax.f32 %v152_v20, 0.0  ;;  %v138_v39 = vpop.f32.mrf.mxu0  ;;  %v158_v47 = vmax.f32 %v142_v40, 0.0 }
  0x90   :  { %v139_v45 = vadd.f32 %v138_v39, %v50_v38 }
  0x92   :  { %v157_v49 = vmax.f32 %v139_v45, 0.0 }
  0x94   :  { %v143_v22 = vpop.f32.mrf.mxu2  ;;  %v153_v23 = vpop.f32.mrf.mxu3  ;;  %v165_v51 = vpack.c.bf16 %v157_v49, %v156_v48 }
  0x95   :  { %v154_v25 = vadd.f32 %v153_v23, %v80_v21  ;;  %v144_v35 = vadd.f32 %v143_v22, %v60_v32 }
  0x97   :  { %v163_v26 = vmax.f32 %v154_v25, 0.0  ;;  %v159_v43 = vmax.f32 %v144_v35, 0.0 }
  0x99   :  { %v168_v28 = vpack.c.bf16 %v163_v26, %v162_v24  ;;  %v166_v50 = vpack.c.bf16 %v159_v43, %v158_v47 }
  0x9b   :  { %183 = vmatpush.bf16.msra.mxu1 %v168_v28 }
  0x9c   :  { %v146_v31 = vpop.f32.mrf.mxu2 }
  0x9d   :  { %v147_v33 = vadd.f32 %v146_v31, %v65_v19 }
  0x9f   :  { %v160_v41 = vmax.f32 %v147_v33, 0.0 }
  0xa4   :  { %v148_v34 = vpop.f32.mrf.mxu2 }
  0xa5   :  { %v149_v37 = vadd.f32 %v148_v34, %v70_v29 }
  0xa7   :  { %v161_v42 = vmax.f32 %v149_v37, 0.0 }
  0xa9   :  { %v167_v46 = vpack.c.bf16 %v161_v42, %v160_v41 }
  0xab   :  { %184 = vmatpush.bf16.msra.mxu1 %v167_v46 }
  0xaf   :  { %185 = vmatpush.bf16.msra.mxu1 %v166_v50 }
  0xb3   :  { %186 = vmatpush.bf16.msra.mxu1 %v165_v51 }
  0xb6   :  { %237 = vmatmul.msk.bf16.vlgmr.msra.gmra.mxu1 %vm175_vm1, %v164_v52 }
 0x133   :  { %v188_v54 = vpop.f32.mrf.mxu1 }
 0x134   :  { %v189_v55 = vadd.f32 %v188_v54, %v173_v53 }
 0x136   :  { %192 = vst [vmem:[#allocation2] sm:$0x3] %v189_v55 }
 0x137   :  { %203 = dma.vmem_to_hbm [thread:$0]  %s199_s22, 32, %s201_s25, [#allocation3]  }
 0x13b   :  { %v190_v56 = vpop.f32.mrf.mxu1 }
 0x13c   :  { %277 = dma.done.wait [#allocation3], 32  }
 0x13d   :  { %278 = vsyncadd [#allocation3], 4294967264 }
 0x13e   :  { %208 = vsyncpa [#allocation3], 1 }

</bundles_post_ra>
